<compile_context>
chip_gen: v5e
topology: v5e:2x2
jax: 0.10.0
libtpu: 0.0.40
codegen_flags: <defaults>
</compile_context>

<pallas_src>
import functools

import jax
import jax.numpy as jnp
from jax.experimental import pallas as pl
from jax.experimental.pallas import tpu as pltpu


# ---------------------------------------------------------------------------
# Kernel 1: DETR prediction heads (class_embed Linear + bbox_embed MLP + sigmoid).
# Inputs are 2-D (N=B*Q rows); weights are pre-transposed to (in, out).
# ---------------------------------------------------------------------------
def _detr_heads_kernel(hs_ref, wc_ref, bc_ref, w1_ref, b1_ref, w2_ref, b2_ref,
                       w3_ref, b3_ref, logits_ref, boxes_ref):
    hs = hs_ref[...].astype(jnp.float32)                       # (N, D)

    def linear(x, w_ref, b_ref):
        return jnp.dot(x, w_ref[...].astype(jnp.float32),
                       preferred_element_type=jnp.float32) + b_ref[...]

    # class_embed
    logits_ref[...] = linear(hs, wc_ref, bc_ref).astype(logits_ref.dtype)
    # bbox_embed: 3-layer MLP with ReLU, then sigmoid
    x = jnp.maximum(linear(hs, w1_ref, b1_ref), 0.0)
    x = jnp.maximum(linear(x, w2_ref, b2_ref), 0.0)
    boxes_ref[...] = jax.nn.sigmoid(linear(x, w3_ref, b3_ref)).astype(boxes_ref.dtype)


@jax.jit
def detr_heads_forward(hs, cls_w, cls_b, w1, b1, w2, b2, w3, b3):
    """pred_logits (bf16) and pred_boxes (f32) from last-layer decoder states hs (B,Q,D)."""
    B, Q, D = hs.shape
    K = cls_w.shape[1]
    H = w1.shape[1]
    N = B * Q
    logits, boxes = pl.pallas_call(
        _detr_heads_kernel,
        out_shape=(jax.ShapeDtypeStruct((N, K), jnp.bfloat16),   # bf16 logits contract
                   jax.ShapeDtypeStruct((N, 4), jnp.float32)),
    )(hs.reshape(N, D), cls_w, cls_b.reshape(1, K),
      w1, b1.reshape(1, H), w2, b2.reshape(1, H), w3, b3.reshape(1, 4))
    return logits.reshape(B, Q, K), boxes.reshape(B, Q, 4)


# ---------------------------------------------------------------------------
# Kernel 2: fused SetCriterion partial sums. One grid step = one batch block.
# Output lane layout per block: [Σ wt*nll, Σ wt, Σ|card_err|, Σ|Δbox|,
#                                Σ(1-giou), #correct_matched, 0...0] (128 lanes).
# ---------------------------------------------------------------------------
def _detr_loss_kernel(logits_ref, tgt_ref, boxes_ref, out_ref,
                      *, num_classes, eos_coef, tgt_per_image):
    logits = logits_ref[...].astype(jnp.float32)            # (bB, Q, K) — f32 in-register
    tgt = tgt_ref[...][:, 0, :]                              # (bB, Q) int32
    bB, Q, K = logits.shape

    cls_iota = jax.lax.broadcasted_iota(jnp.int32, (bB, Q, K), 2)
    mask_noobj = cls_iota == (K - 1)                          # computed once, reused

    # ---- shared lane reductions (4 total over (bB,Q,K)) ----
    noobj = jnp.sum(jnp.where(mask_noobj, logits, 0.0), axis=-1)              # (bB,Q)
    other_max = jnp.max(jnp.where(mask_noobj, -jnp.inf, logits), axis=-1)     # (bB,Q)
    m = jnp.maximum(other_max, noobj)                                          # row max

    # ---- weighted cross-entropy (no log-softmax materialization) ----
    lse = m + jnp.log(jnp.sum(jnp.exp(logits - m[:, :, None]), axis=-1))      # (bB,Q)
    tgt_logit = jnp.sum(jnp.where(cls_iota == tgt[:, :, None], logits, 0.0),
                        axis=-1)                                              # (bB,Q)
    nll = lse - tgt_logit
    wt = jnp.where(tgt == num_classes, jnp.float32(eos_coef), jnp.float32(1.0))
    ce_num = jnp.sum(wt * nll)
    ce_den = jnp.sum(wt)

    # ---- cardinality error: (#argmax != no-object) vs #targets (L1) ----
    not_empty = (other_max >= noobj).astype(jnp.float32)   # >= matches argmax tiebreak
    card_pred = jnp.sum(not_empty, axis=1, keepdims=True)                     # (bB,1)
    card_sum = jnp.sum(jnp.abs(card_pred - jnp.float32(tgt_per_image)))

    # ---- class_error numerator: matched (q < T) queries with correct top-1 ----
    q_iota = jax.lax.broadcasted_iota(jnp.int32, (bB, Q), 1)
    matched = q_iota < tgt_per_image
    correct = jnp.sum(jnp.where(jnp.logical_and(matched, tgt_logit >= m), 1.0, 0.0))

    # ---- matched box losses: (1, 8, Nb) tile, src = sublanes 0-3, tgt = 4-7 ----
    boxes = boxes_ref[...].astype(jnp.float32)
    s = boxes[:, 0:4, :]
    t = boxes[:, 4:8, :]
    l1_sum = jnp.sum(jnp.abs(s - t))

    eps = jnp.float32(1e-7)
    scx, scy, sw, sh = s[:, 0, :], s[:, 1, :], s[:, 2, :], s[:, 3, :]          # (1, Nb)
    tcx, tcy, tw, th = t[:, 0, :], t[:, 1, :], t[:, 2, :], t[:, 3, :]
    sx0, sy0, sx1, sy1 = scx - 0.5 * sw, scy - 0.5 * sh, scx + 0.5 * sw, scy + 0.5 * sh
    tx0, ty0, tx1, ty1 = tcx - 0.5 * tw, tcy - 0.5 * th, tcx + 0.5 * tw, tcy + 0.5 * th

    area_s = (sx1 - sx0) * (sy1 - sy0)
    area_t = (tx1 - tx0) * (ty1 - ty0)
    iw = jnp.maximum(jnp.minimum(sx1, tx1) - jnp.maximum(sx0, tx0), 0.0)
    ih = jnp.maximum(jnp.minimum(sy1, ty1) - jnp.maximum(sy0, ty0), 0.0)
    inter = iw * ih
    union = area_s + area_t - inter
    iou = inter / (union + eps)

    ew = jnp.maximum(jnp.maximum(sx1, tx1) - jnp.minimum(sx0, tx0), 0.0)
    eh = jnp.maximum(jnp.maximum(sy1, ty1) - jnp.minimum(sy0, ty0), 0.0)
    earea = ew * eh
    giou = iou - (earea - union) / (earea + eps)
    giou_sum = jnp.sum(1.0 - giou)

    # ---- lane-dense (128-wide) output row: unmasked stores ----
    lane = jax.lax.broadcasted_iota(jnp.int32, (1, 1, 128), 2)
    row = jnp.where(lane == 0, ce_num, jnp.float32(0.0))
    row = jnp.where(lane == 1, ce_den, row)
    row = jnp.where(lane == 2, card_sum, row)
    row = jnp.where(lane == 3, l1_sum, row)
    row = jnp.where(lane == 4, giou_sum, row)
    row = jnp.where(lane == 5, correct, row)
    out_ref[...] = row


# ---------------------------------------------------------------------------
# Generation-aware block / VMEM budgeting.
# ---------------------------------------------------------------------------
def _tpu_layout_hints():
    """(#TensorCores per chip, per-step f32-equivalent logits block cap)."""
    try:
        kind = jax.devices()[0].device_kind.lower()
    except Exception:  # pragma: no cover - fall back to single-TC-safe settings
        kind = ""
    if "7" in kind:                     # v7x: 2 TCs, 64 MiB physical VMEM
        return 2, 4 << 20               # 4 MiB f32 block -> G>=2 uses both cores
    return 1, 8 << 20                   # v5e/v6e: single TC, 128 MiB VMEM -> big block, G=1


def _pick_batch_block(B, Q, K, num_tc, max_f32_block_bytes):
    """Largest divisor of B whose f32 working block fits the cap; prefer G >= num_tc."""
    per_b = Q * K * 4
    fit = [d for d in range(1, B + 1) if B % d == 0 and d * per_b <= max_f32_block_bytes]
    if not fit:
        return 1
    par = [d for d in fit if (B // d) >= num_tc]
    return max(par) if par else max(fit)


def _vmem_budget_bytes(batch_block, Q, K, T, logits_itemsize):
    """2x double-buffered input blocks + ~4x block of f32 temporaries + slack."""
    logits_blk = batch_block * Q * K * logits_itemsize
    tgt_blk = batch_block * Q * 4
    box_blk = 8 * batch_block * T * 4
    f32_blk = batch_block * Q * K * 4
    budget = 2 * (logits_blk + tgt_blk + box_blk) + 4 * f32_blk + 2 * 128 * 4 + (2 << 20)
    return int(max(budget, 32 << 20))


# ---------------------------------------------------------------------------
# Jitted wrapper (all glue ops fuse; loss finalization is one executable).
# ---------------------------------------------------------------------------
@functools.partial(jax.jit, static_argnames=("num_classes", "eos_coef", "batch_block",
                                             "vmem_limit", "num_boxes"))
def _criterion_impl(pred_logits, pred_boxes, tgt_labels, tgt_boxes, *,
                    num_classes, eos_coef, batch_block, vmem_limit, num_boxes):
    B, Q, K = pred_logits.shape
    T = tgt_labels.shape[1]
    G = B // batch_block
    Nb = batch_block * T

    # identity matcher: targets map to the first T queries; pad rest with no-object.
    target_classes = jnp.pad(tgt_labels.astype(jnp.int32), ((0, 0), (0, Q - T)),
                             constant_values=num_classes)              # (B, Q)
    tgt_cls_in = target_classes[:, None, :]                            # (B, 1, Q)

    # stacked lane-dense boxes: (G, 8, Nb): src coords on sublanes 0-3, tgt on 4-7.
    pb = pred_boxes[:, :T, :].astype(jnp.float32).reshape(G, Nb, 4)
    tb = tgt_boxes.astype(jnp.float32).reshape(G, Nb, 4)
    boxes_stacked = jnp.swapaxes(jnp.concatenate([pb, tb], axis=-1), 1, 2)

    kernel = functools.partial(_detr_loss_kernel, num_classes=num_classes,
                               eos_coef=eos_coef, tgt_per_image=T)

    parts = pl.pallas_call(
        kernel,
        grid=(G,),
        in_specs=[
            pl.BlockSpec((batch_block, Q, K), lambda i: (i, 0, 0)),
            pl.BlockSpec((batch_block, 1, Q), lambda i: (i, 0, 0)),
            pl.BlockSpec((1, 8, Nb), lambda i: (i, 0, 0)),
        ],
        out_specs=pl.BlockSpec((1, 1, 128), lambda i: (i, 0, 0)),
        out_shape=jax.ShapeDtypeStruct((G, 1, 128), jnp.float32),
        compiler_params=pltpu.CompilerParams(
            dimension_semantics=("parallel",),
            vmem_limit_bytes=vmem_limit),
    )(pred_logits, tgt_cls_in, boxes_stacked)

    sums = jnp.sum(parts, axis=(0, 1))                                 # (128,)
    nb = jnp.maximum(jnp.float32(num_boxes), 1.0)
    loss_ce = sums[0] / sums[1]                  # PyTorch weighted-mean CE reduction
    cardinality_error = sums[2] / B              # mean over batch
    loss_bbox = sums[3] / nb
    loss_giou = sums[4] / nb
    class_error = 100.0 * (1.0 - sums[5] / float(B * T))

    return {
        "loss_ce": loss_ce,
        "class_error": class_error,
        "cardinality_error": cardinality_error,
        "loss_bbox": loss_bbox,
        "loss_giou": loss_giou,
    }


def set_criterion_forward(pred_logits, pred_boxes, tgt_labels, tgt_boxes,
                          num_classes, eos_coef=0.1, batch_block=None, num_boxes=None):
    """SetCriterion.forward for losses = ['labels', 'cardinality', 'boxes'].

    pred_logits may (and should) arrive in bf16 — the kernel casts in-register.
    """
    B, Q, K = pred_logits.shape
    T = tgt_labels.shape[1]
    assert K == num_classes + 1
    assert 1 <= T <= Q

    num_tc, f32_block_cap = _tpu_layout_hints()
    if batch_block is None:
        batch_block = _pick_batch_block(B, Q, K, num_tc, f32_block_cap)
    assert B % batch_block == 0
    vmem_limit = _vmem_budget_bytes(batch_block, Q, K, T,
                                    jnp.dtype(pred_logits.dtype).itemsize)

    if num_boxes is None:
        # dense targets here; real DETR clamps the actual GT count and all-reduces it.
        num_boxes = float(B * T)

    return _criterion_impl(pred_logits, pred_boxes, tgt_labels, tgt_boxes,
                           num_classes=int(num_classes), eos_coef=float(eos_coef),
                           batch_block=int(batch_block), vmem_limit=int(vmem_limit),
                           num_boxes=float(num_boxes))


if __name__ == "__main__":
    key = jax.random.PRNGKey(0)
    B, Q, D, num_classes, T = 2, 8, 32, 4, 3
    K = num_classes + 1

    ks = jax.random.split(key, 8)
    # hs = last decoder-layer hidden states (backbone/transformer not translated).
    hs = jax.random.normal(ks[0], (B, Q, D), jnp.float32)
    cls_w = 0.1 * jax.random.normal(ks[1], (D, K), jnp.float32)
    cls_b = jnp.zeros((K,), jnp.float32)
    w1 = 0.1 * jax.random.normal(ks[2], (D, D), jnp.float32)
    b1 = jnp.zeros((D,), jnp.float32)
    w2 = 0.1 * jax.random.normal(ks[3], (D, D), jnp.float32)
    b2 = jnp.zeros((D,), jnp.float32)
    w3 = 0.1 * jax.random.normal(ks[4], (D, 4), jnp.float32)
    b3 = jnp.zeros((4,), jnp.float32)

    tgt_labels = jax.random.randint(ks[5], (B, T), 0, num_classes)
    tgt_boxes = jax.random.uniform(ks[6], (B, T, 4), jnp.float32, minval=0.2, maxval=0.6)

    # DETR heads: pred_logits (bf16), pred_boxes in (cx, cy, w, h) in (0, 1).
    pred_logits, pred_boxes = detr_heads_forward(hs, cls_w, cls_b, w1, b1, w2, b2, w3, b3)

    # Fused SetCriterion loss (auto batch-block: G=1 on v5e/v6e, G=2 on v7x).
    losses = set_criterion_forward(pred_logits, pred_boxes, tgt_labels, tgt_boxes,
                                   num_classes=num_classes, eos_coef=0.1)
    jax.block_until_ready(losses)
    print("KERNEL_OK")
</pallas_src>

<mosaic_0001>
module attributes {stable_mosaic.version = 11 : i64} {
  func.func @_detr_heads_kernel(%arg0: memref<16x32xf32, #tpu.memory_space<vmem>>, %arg1: memref<32x5xf32, #tpu.memory_space<vmem>>, %arg2: memref<1x5xf32, #tpu.memory_space<vmem>>, %arg3: memref<32x32xf32, #tpu.memory_space<vmem>>, %arg4: memref<1x32xf32, #tpu.memory_space<vmem>>, %arg5: memref<32x32xf32, #tpu.memory_space<vmem>>, %arg6: memref<1x32xf32, #tpu.memory_space<vmem>>, %arg7: memref<32x4xf32, #tpu.memory_space<vmem>>, %arg8: memref<1x4xf32, #tpu.memory_space<vmem>>, %arg9: memref<16x5xbf16, #tpu.memory_space<vmem>>, %arg10: memref<16x4xf32, #tpu.memory_space<vmem>>) attributes {dimension_semantics = [], scalar_prefetch = 0 : i64, scratch_operands = 0 : i64, tpu.core_type = #tpu.core_type<tc>} {
    %c0 = arith.constant 0 : index
    %c0_0 = arith.constant 0 : index
    %0 = vector.load %arg0[%c0, %c0_0] : memref<16x32xf32, #tpu.memory_space<vmem>>, vector<16x32xf32>
    %c0_1 = arith.constant 0 : index
    %c0_2 = arith.constant 0 : index
    %1 = vector.load %arg1[%c0_1, %c0_2] : memref<32x5xf32, #tpu.memory_space<vmem>>, vector<32x5xf32>
    %cst = arith.constant dense<0.000000e+00> : vector<16x5xf32>
    %2 = tpu.matmul %0, %1, %cst {dimension_numbers = #tpu.dot_dimension_numbers<[1], [0], [0], [1], [0, 0, 1, 1], [], []>} : vector<16x32xf32>, vector<32x5xf32>, vector<16x5xf32> -> vector<16x5xf32>
    %c0_3 = arith.constant 0 : index
    %c0_4 = arith.constant 0 : index
    %3 = vector.load %arg2[%c0_3, %c0_4] : memref<1x5xf32, #tpu.memory_space<vmem>>, vector<1x5xf32>
    %4 = vector.broadcast %3 : vector<1x5xf32> to vector<16x5xf32>
    %5 = arith.addf %2, %4 : vector<16x5xf32>
    %6 = arith.truncf %5 : vector<16x5xf32> to vector<16x5xbf16>
    %c0_5 = arith.constant 0 : index
    %c0_6 = arith.constant 0 : index
    %7 = vector.load %arg9[%c0_5, %c0_6] : memref<16x5xbf16, #tpu.memory_space<vmem>>, vector<16x5xbf16>
    tpu.vector_store %arg9[%c0_5, %c0_6], %6 {strides = array<i32>} : memref<16x5xbf16, #tpu.memory_space<vmem>>, vector<16x5xbf16>,
    %c0_7 = arith.constant 0 : index
    %c0_8 = arith.constant 0 : index
    %8 = vector.load %arg3[%c0_7, %c0_8] : memref<32x32xf32, #tpu.memory_space<vmem>>, vector<32x32xf32>
    %cst_9 = arith.constant dense<0.000000e+00> : vector<16x32xf32>
    %9 = tpu.matmul %0, %8, %cst_9 {dimension_numbers = #tpu.dot_dimension_numbers<[1], [0], [0], [1], [0, 0, 1, 1], [], []>} : vector<16x32xf32>, vector<32x32xf32>, vector<16x32xf32> -> vector<16x32xf32>
    %c0_10 = arith.constant 0 : index
    %c0_11 = arith.constant 0 : index
    %10 = vector.load %arg4[%c0_10, %c0_11] : memref<1x32xf32, #tpu.memory_space<vmem>>, vector<1x32xf32>
    %11 = vector.broadcast %10 : vector<1x32xf32> to vector<16x32xf32>
    %12 = arith.addf %9, %11 : vector<16x32xf32>
    %cst_12 = arith.constant 0.000000e+00 : f32
    %13 = vector.broadcast %cst_12 : f32 to vector<16x32xf32>
    %14 = arith.maximumf %12, %13 : vector<16x32xf32>
    %c0_13 = arith.constant 0 : index
    %c0_14 = arith.constant 0 : index
    %15 = vector.load %arg5[%c0_13, %c0_14] : memref<32x32xf32, #tpu.memory_space<vmem>>, vector<32x32xf32>
    %cst_15 = arith.constant dense<0.000000e+00> : vector<16x32xf32>
    %16 = tpu.matmul %14, %15, %cst_15 {dimension_numbers = #tpu.dot_dimension_numbers<[1], [0], [0], [1], [0, 0, 1, 1], [], []>} : vector<16x32xf32>, vector<32x32xf32>, vector<16x32xf32> -> vector<16x32xf32>
    %c0_16 = arith.constant 0 : index
    %c0_17 = arith.constant 0 : index
    %17 = vector.load %arg6[%c0_16, %c0_17] : memref<1x32xf32, #tpu.memory_space<vmem>>, vector<1x32xf32>
    %18 = vector.broadcast %17 : vector<1x32xf32> to vector<16x32xf32>
    %19 = arith.addf %16, %18 : vector<16x32xf32>
    %cst_18 = arith.constant 0.000000e+00 : f32
    %20 = vector.broadcast %cst_18 : f32 to vector<16x32xf32>
    %21 = arith.maximumf %19, %20 : vector<16x32xf32>
    %c0_19 = arith.constant 0 : index
    %c0_20 = arith.constant 0 : index
    %22 = vector.load %arg7[%c0_19, %c0_20] : memref<32x4xf32, #tpu.memory_space<vmem>>, vector<32x4xf32>
    %cst_21 = arith.constant dense<0.000000e+00> : vector<16x4xf32>
    %23 = tpu.matmul %21, %22, %cst_21 {dimension_numbers = #tpu.dot_dimension_numbers<[1], [0], [0], [1], [0, 0, 1, 1], [], []>} : vector<16x32xf32>, vector<32x4xf32>, vector<16x4xf32> -> vector<16x4xf32>
    %c0_22 = arith.constant 0 : index
    %c0_23 = arith.constant 0 : index
    %24 = vector.load %arg8[%c0_22, %c0_23] : memref<1x4xf32, #tpu.memory_space<vmem>>, vector<1x4xf32>
    %25 = vector.broadcast %24 : vector<1x4xf32> to vector<16x4xf32>
    %26 = arith.addf %23, %25 : vector<16x4xf32>
    %27 = arith.negf %26 : vector<16x4xf32>
    %28 = math.exp %27 : vector<16x4xf32>
    %cst_24 = arith.constant 1.000000e+00 : f32
    %29 = vector.broadcast %cst_24 : f32 to vector<16x4xf32>
    %30 = arith.addf %29, %28 : vector<16x4xf32>
    %31 = arith.divf %29, %30 : vector<16x4xf32>
    %c0_25 = arith.constant 0 : index
    %c0_26 = arith.constant 0 : index
    %32 = vector.load %arg10[%c0_25, %c0_26] : memref<16x4xf32, #tpu.memory_space<vmem>>, vector<16x4xf32>
    tpu.vector_store %arg10[%c0_25, %c0_26], %31 {strides = array<i32>} : memref<16x4xf32, #tpu.memory_space<vmem>>, vector<16x4xf32>,
    return
  }
}

</mosaic_0001>

<bundles_post_ra>
// kernel: detr_heads_forward.1
= control target key start
LH: loop header
LB: loop body
LE: loop exit
PB: predicated region body
PF: predicated region fallthrough
CT: control target
= control target key end

     0   :  { %16 = vsyncpa [#allocation3], 0  ;;  %s305_s16 = smov [#allocation2]   ;;  %s306_s18 = smov 128   ;;  %s448_s0 = inlined_call_operand.hbm [shape: f32[16,32], index: 0, kind: input, shape index: {}]   ;;  %s449_s1 = inlined_call_operand.vmem [shape: f32[32,5], index: 1, kind: input, shape index: {}]   ;;  %s450_s2 = inlined_call_operand.vmem [shape: f32[1,5], index: 2, kind: input, shape index: {}]   ;;  %s451_s3 = inlined_call_operand.vmem [shape: f32[32,32], index: 3, kind: input, shape index: {}]   ;;  %s452_s4 = inlined_call_operand.vmem [shape: f32[1,32], index: 4, kind: input, shape index: {}]   ;;  %s453_s5 = inlined_call_operand.vmem [shape: f32[32,32], index: 5, kind: input, shape index: {}]   ;;  %s454_s6 = inlined_call_operand.vmem [shape: f32[1,32], index: 6, kind: input, shape index: {}]   ;;  %s455_s7 = inlined_call_operand.vmem [shape: f32[32,4], index: 7, kind: input, shape index: {}]   ;;  %s456_s8 = inlined_call_operand.vmem [shape: f32[1,4], index: 8, kind: input, shape index: {}]   ;;  %s457_s9 = inlined_call_operand.vmem [shape: bf16[16,5], index: 9, kind: output, shape index: {0}]   ;;  %s458_s10 = inlined_call_operand.vmem [shape: f32[16,4], index: 10, kind: output, shape index: {1}]  }
   0x1   :  { %s21_s15 = sshll.u32 %s448_s0, 4  ;;  %s23_s17 = sshll.u32 %s305_s16, 4  ;;  %s22_s15 = int_to_ptr.hbm [resolvable:$true] %s21_s15  ;;  %s24_s17 = int_to_ptr.vmem [resolvable:$true] %s23_s17 }
   0x2   :  { %s307_s19 = smov 8  }
   0x3   :  { %29 = dma.hbm_to_vmem [thread:$0]  %s22_s15, 256, %s24_s17, [#allocation3], %s306_s18, %s306_s18, %s307_s19  }
   0x4   :  { %303 = dma.done.wait [#allocation3], 256  }
   0x5   :  { %304 = vsyncadd [#allocation3], 4294967040  ;;  %v98_v0 = vld [vmem:[%s451_s3 + $0x18] sm:$0xff]  ;;  %v97_v1 = vld [vmem:[%s451_s3 + $0x10] sm:$0xff]  ;;  %vm60_vm0 = vcmask 261120   ;;  %vm92_vm1 = vcmask 35840  }
   0x6   :  { %115 = vmatpush.msra.mxu1 %v98_v0  ;;  %v96_v2 = vld [vmem:[%s451_s3 + $0x8] sm:$0xff]  ;;  %v131_v3 = vld [vmem:[%s453_s5 + $0x18] sm:$0xff]  ;;  %v95_v4 = vld [vmem:[%s451_s3] sm:$0xff]  ;;  %vm242_vm5 = vcmask 31744  }
   0x7   :  { %154 = vmatpush.msra.mxu2 %v131_v3  ;;  %v50_v5 = vld [vmem:[#allocation2] sm:$0xff]  ;;  %v51_v6 = vld [vmem:[#allocation2 + $0x8] sm:$0xff]  ;;  %v130_v7 = vld [vmem:[%s453_s5 + $0x10] sm:$0xff] }
   0x8   :  { %116 = vmatpush.msra.mxu1 %v97_v1  ;;  %v129_v8 = vld [vmem:[%s453_s5 + $0x8] sm:$0xff]  ;;  %v128_v9 = vld [vmem:[%s453_s5] sm:$0xff]  ;;  %v170_v10 = vld [vmem:[%s455_s7 + $0x18] sm:$0xff] }
   0x9   :  { %155 = vmatpush.msra.mxu2 %v130_v7  ;;  %193 = vmatpush.msra.mxu3 %v170_v10  ;;  %v267_v11 = vld [vmem:[%s452_s4] ss:$0 sm:$0xff]  ;;  %v169_v18 = vld [vmem:[%s455_s7 + $0x10] sm:$0xff]  ;;  %v168_v19 = vld [vmem:[%s455_s7 + $0x8] sm:$0xff] }
   0xa   :  { %117 = vmatpush.msra.mxu1 %v96_v2  ;;  %v167_v20 = vld [vmem:[%s455_s7] sm:$0xff]  ;;  %v55_v21 = vld [vmem:[%s449_s1 + $0x18] sm:$0xff]  ;;  %v54_v22 = vld [vmem:[%s449_s1 + $0x10] sm:$0xff] }
   0xb   :  { %156 = vmatpush.msra.mxu2 %v129_v8  ;;  %194 = vmatpush.msra.mxu3 %v169_v18  ;;  %v53_v23 = vld [vmem:[%s449_s1 + $0x8] sm:$0xff]  ;;  %v52_v24 = vld [vmem:[%s449_s1] sm:$0xff] }
   0xc   :  { %118 = vmatpush.msra.mxu1 %v95_v4  ;;  %79 = vmatpush.msra.mxu0 %v55_v21  ;;  %v268_v25 = vld [vmem:[%s454_s6] ss:$0 sm:$0xff] }
   0xd   :  { %256 = vmatmul.msk.f32.vlgmr.msra.gmra.mxu1 %vm60_vm0, %v50_v5  ;;  %157 = vmatpush.msra.mxu2 %v128_v9  ;;  %v270_v32 = vld [vmem:[%s450_s2] ss:$0 sm:$0xff] }
   0xe   :  { %195 = vmatpush.msra.mxu3 %v168_v19  ;;  %80 = vmatpush.msra.mxu0 %v54_v22  ;;  %v269_v35 = vld [vmem:[%s456_s8] ss:$0 sm:$0xff] }
  0x10   :  { %196 = vmatpush.msra.mxu3 %v167_v20  ;;  %81 = vmatpush.msra.mxu0 %v53_v23 }
  0x12   :  { %82 = vmatpush.msra.mxu0 %v52_v24 }
  0x13   :  { %254 = vmatmul.msk.f32.vlgmr.msra.gmra.mxu0 %vm60_vm0, %v50_v5 }
  0x15   :  { %257 = vmatmul.msk.f32.gmra.mxu1 %vm60_vm0, %v51_v6 }
  0x1b   :  { %255 = vmatmul.msk.f32.gmra.mxu0 %vm60_vm0, %v51_v6 }
  0x8a   :  { %v120_v12 = vpop.f32.mrf.mxu1 }
  0x8b   :  { %v121_v13 = vadd.f32 %v267_v11, %v120_v12 }
  0x8d   :  { %v126_v14 = vmax.f32 %v121_v13, 0.0 }
  0x8f   :  { %258 = vmatmul.msk.f32.vlgmr.msra.gmra.mxu2 %vm60_vm0, %v126_v14 }
  0x90   :  { %v84_v33 = vpop.f32.mrf.mxu0 }
  0x91   :  { %v85_v34 = vadd.f32 %v270_v32, %v84_v33 }
  0x92   :  { %v123_v15 = vpop.f32.mrf.mxu1 }
  0x93   :  { %v124_v16 = vadd.f32 %v267_v11, %v123_v15  ;;  %v90_v36 = vpack.c.bf16 %v85_v34, %v85_v34 }
  0x95   :  { %v127_v17 = vmax.f32 %v124_v16, 0.0  ;;  %93 = vst.msk [vmem:[%s457_s9] sm:$0xf] %vm92_vm1, %v90_v36 }
  0x97   :  { %259 = vmatmul.msk.f32.gmra.mxu2 %vm60_vm0, %v127_v17 }
  0x98   :  { %v87_v39 = vpop.f32.mrf.mxu0 }
  0x99   :  { %v88_v41 = vadd.f32 %v270_v32, %v87_v39 }
  0x9b   :  { %v91_v42 = vpack.c.bf16 %v88_v41, %v88_v41 }
  0x9d   :  { %94 = vst.msk [vmem:[%s457_s9 + $0x4] sm:$0xf] %vm92_vm1, %v91_v42 }
 0x112   :  { %v159_v26 = vpop.f32.mrf.mxu2 }
 0x113   :  { %v160_v27 = vadd.f32 %v268_v25, %v159_v26 }
 0x115   :  { %v165_v28 = vmax.f32 %v160_v27, 0.0 }
 0x117   :  { %260 = vmatmul.msk.f32.vlgmr.msra.gmra.mxu3 %vm60_vm0, %v165_v28 }
 0x11a   :  { %v162_v29 = vpop.f32.mrf.mxu2 }
 0x11b   :  { %v163_v30 = vadd.f32 %v268_v25, %v162_v29 }
 0x11d   :  { %v166_v31 = vmax.f32 %v163_v30, 0.0 }
 0x11f   :  { %261 = vmatmul.msk.f32.gmra.mxu3 %vm60_vm0, %v166_v31 }
 0x19a   :  { %v198_v37 = vpop.f32.mrf.mxu3 }
 0x19b   :  { %v199_v38 = vadd.f32 %v269_v35, %v198_v37 }
 0x19d   :  { %v262_v40 = vmul.f32 -1.442695, %v199_v38 }
 0x19f   :  { %271 = vpow2.f32 %v262_v40 }
 0x1a2   :  { %v201_v43 = vpop.f32.mrf.mxu3 }
 0x1a3   :  { %v202_v44 = vadd.f32 %v269_v35, %v201_v43 }
 0x1a5   :  { %v272_v45 = vpop.eup %271  ;;  %v263_v46 = vmul.f32 -1.442695, %v202_v44 }
 0x1a6   :  { %v210_v47 = vadd.f32 1.0, %v272_v45 }
 0x1a7   :  { %273 = vpow2.f32 %v263_v46 }
 0x1a8   :  { %275 = vrcp.f32 %v210_v47  ;;  %v223_v53 = vand.u32 2147483648, %v210_v47  ;;  %v221_v55 = vand.u32 2147483647, %v210_v47  ;;  %vm217_vm3 = vweird.f32 %v210_v47 }
 0x1aa   :  { %v224_v58 = vor.u32 1.1754944e-38, %v223_v53  ;;  %vm222_vm6 = vcmp.eq.f32.partialorder %v221_v55, 8.507059e+37 }
 0x1ad   :  { %v274_v48 = vpop.eup %273 }
 0x1ae   :  { %v276_v49 = vpop.eup %275  ;;  %v211_v50 = vadd.f32 1.0, %v274_v48 }
 0x1af   :  { %v213_v51 = vmul.f32 %v276_v49, %v210_v47  ;;  %vm218_vm2 = vweird.f32 %v276_v49 }
 0x1b0   :  { %277 = vrcp.f32 %v211_v50  ;;  %vm219_vm4 = vmor %vm217_vm3, %vm218_vm2  ;;  %v238_v63 = vand.u32 2147483648, %v211_v50  ;;  %v236_v1 = vand.u32 2147483647, %v211_v50  ;;  %vm232_vm8 = vweird.f32 %v211_v50 }
 0x1b1   :  { %v214_v52 = vsub.f32 1.0, %v213_v51 }
 0x1b2   :  { %v239_v3 = vor.u32 1.1754944e-38, %v238_v63  ;;  %vm237_vm10 = vcmp.eq.f32.partialorder %v236_v1, 8.507059e+37 }
 0x1b3   :  { %v215_v54 = vmul.f32 %v276_v49, %v214_v52 }
 0x1b5   :  { %v216_v56 = vadd.f32 %v276_v49, %v215_v54 }
 0x1b6   :  { %v278_v57 = vpop.eup %277 }
 0x1b7   :  { %v220_v59 = vsel %vm219_vm4, %v276_v49, %v216_v56  ;;  %v228_v60 = vmul.f32 %v278_v57, %v211_v50  ;;  %vm233_vm7 = vweird.f32 %v278_v57 }
 0x1b8   :  { %v225_v61 = vsel %vm222_vm6, %v224_v58, %v220_v59  ;;  %vm234_vm9 = vmor %vm232_vm8, %vm233_vm7 }
 0x1b9   :  { %243 = vst.msk [vmem:[%s458_s10] sm:$0xff] %vm242_vm5, %v225_v61  ;;  %v229_v62 = vsub.f32 1.0, %v228_v60 }
 0x1bb   :  { %v230_v0 = vmul.f32 %v278_v57, %v229_v62 }
 0x1bd   :  { %v231_v2 = vadd.f32 %v278_v57, %v230_v0 }
 0x1bf   :  { %v235_v4 = vsel %vm234_vm9, %v278_v57, %v231_v2 }
 0x1c0   :  { %v240_v5 = vsel %vm237_vm10, %v239_v3, %v235_v4 }
 0x1c1   :  { %244 = vst.msk [vmem:[%s458_s10 + $0x8] sm:$0xff] %vm242_vm5, %v240_v5 }
 0x1c2   :  { %253 = vsyncpa [#allocation3], 1 }

</bundles_post_ra>
